<compile_context>
chip_gen: v5e
topology: v5e:2x2
jax: 0.10.0
libtpu: 0.0.40
codegen_flags: <defaults>
</compile_context>

<pallas_src>
import functools
import math

import jax
import jax.numpy as jnp
from jax.experimental import pallas as pl
from jax.experimental.pallas import tpu as pltpu


def _round_up(v, m):
    return ((v + m - 1) // m) * m


def gat_kernel(x_ref, adj_ref, w_ref, bias_ref, o_ref, *, alpha, P, binary_adj):
    """One grid step == one graph.

    x_ref    : (1, N, Fin)       node features (compute dtype, e.g. bf16)
    adj_ref  : (1, N, N)         adjacency (int8 mask if binary_adj, else f32)
    w_ref    : (Fin, 2P+128)     fused [ W | Wc(or I) | W@a1, W@a2, 0... ]
    bias_ref : (N, P)            per-node bias + conv bias, f32
    o_ref    : (1, N, P)         output block
    """
    cdt = x_ref.dtype  # MXU operand dtype (bf16 on v6e/v7x for ~2-4x MXU rate)

    x = x_ref[0]                                                   # (N, Fin)

    # Single MXU pass over x produces h, the skip projection and the two
    # attention-logit columns (a1/a2 folded into the weight host-side).
    hc = jnp.dot(x, w_ref[...], preferred_element_type=jnp.float32)  # (N, 2P+128) f32
    h = hc[:, :P]                                                  # (N, P)
    skip = hc[:, P:2 * P]                                          # (N, P)
    f1 = hc[:, 2 * P:2 * P + 1]                                    # (N, 1)
    f2 = hc[:, 2 * P + 1:2 * P + 2]                                # (N, 1)

    # e[i, j] = leakyrelu(f1[i] + f2[j]); alpha <= 1 so max() == leakyrelu.
    e = f1 + f2.T                                                  # (N, N)
    e = jnp.maximum(e, alpha * e)

    # attention = adj * e ; softmax over dim=1 of (B, N, N) == axis 0 here.
    if binary_adj:
        att = jnp.where(adj_ref[0].astype(jnp.float32) != 0.0, e, 0.0)
    else:
        att = adj_ref[0].astype(jnp.float32) * e
    att = att - jnp.max(att, axis=0, keepdims=True)
    att = jnp.exp(att)
    att = att * pl.reciprocal(jnp.sum(att, axis=0, keepdims=True), approx=True)
    # TODO(synk): F.dropout on the attention is identity in eval mode; not applied.

    # h_prime = attention @ h + (bias + conv bias) + skip.
    h_prime = jnp.dot(att.astype(cdt), h.astype(cdt),
                      preferred_element_type=jnp.float32)          # (N, P)
    o_ref[0] = (h_prime + bias_ref[...] + skip).astype(o_ref.dtype)


def gat_forward(x, adj, W, a1, a2, bias, Wc, bc, alpha, *,
                compute_dtype=jnp.bfloat16, binary_adj=True):
    B, N, Fin = x.shape
    Fout = W.shape[1]
    use_downsample = (Fin != Fout)

    # Lane-dense output feature axis (unmasked vst); padding sliced off below.
    P = _round_up(Fout, 128)
    pad_f = P - Fout

    W_p = jnp.pad(W, ((0, 0), (0, pad_f)))                         # (Fin, P)

    if use_downsample:
        Wc_eff = Wc                                                # Conv1d(in,out,1) == linear
        bc_eff = bc                                                # (1, Fout)
    else:
        # Identity residual: skip = x == x @ I, produced by the same MXU pass
        # (keeps the contraction dim at Fin -- no K zero-padding).
        Wc_eff = jnp.eye(Fin, Fout, dtype=W.dtype)
        bc_eff = jnp.zeros((1, Fout), W.dtype)
    Wc_p = jnp.pad(Wc_eff, ((0, 0), (0, pad_f)))                   # (Fin, P)

    # Fold a1/a2 into the projection: f1 = x @ (W @ a1), f2 = x @ (W @ a2).
    Wa = jnp.concatenate([W @ a1, W @ a2], axis=1)                 # (Fin, 2)
    Wa_p = jnp.pad(Wa, ((0, 0), (0, 128 - 2)))                     # (Fin, 128)

    W_cat = jnp.concatenate([W_p, Wc_p, Wa_p], axis=1).astype(compute_dtype)
    Wcols = W_cat.shape[1]                                         # 2P + 128

    # Per-node bias + conv bias, padded to P lanes, kept f32.
    bias_eff = jnp.pad(bias + bc_eff, ((0, 0), (0, pad_f))).astype(jnp.float32)

    x_c = x.astype(compute_dtype)
    adj_k = (adj != 0).astype(jnp.int8) if binary_adj else adj.astype(jnp.float32)

    kernel = functools.partial(gat_kernel, alpha=alpha, P=P, binary_adj=binary_adj)

    in_specs = [
        pl.BlockSpec((1, N, Fin), lambda b: (b, 0, 0)),            # x  (per graph)
        pl.BlockSpec((1, N, N), lambda b: (b, 0, 0)),              # adj (per graph)
        pl.BlockSpec((Fin, Wcols), lambda b: (0, 0)),              # fused weights (constant)
        pl.BlockSpec((N, P), lambda b: (0, 0)),                    # bias (constant)
    ]
    out_spec = pl.BlockSpec((1, N, P), lambda b: (b, 0, 0))

    def _nbytes(a):
        return int(a.size) * int(a.dtype.itemsize)

    # VMEM budget: double-buffered blocks + generous headroom, capped at the
    # v7x per-core physical budget.
    block_bytes = (2 * N * Fin * int(jnp.dtype(compute_dtype).itemsize)
                   + 2 * N * N * int(adj_k.dtype.itemsize)
                   + 2 * _nbytes(W_cat) + 2 * _nbytes(bias_eff)
                   + 2 * N * P * 4)
    vmem_limit = int(min(64 * 1024 * 1024, max(16 * 1024 * 1024, 4 * block_bytes)))

    flops = int(B * (2 * N * Fin * Wcols       # fused projection
                     + 2 * N * N * P           # attention @ h
                     + 10 * N * N))            # leakyrelu / mask / softmax elementwise
    transcendentals = int(B * N * N)           # exp (reciprocals negligible)
    bytes_accessed = int(_nbytes(x_c) + _nbytes(adj_k) + _nbytes(W_cat)
                         + _nbytes(bias_eff) + B * N * P * 4)
    cost = pl.CostEstimate(flops=flops, transcendentals=transcendentals,
                           bytes_accessed=bytes_accessed)

    out = pl.pallas_call(
        kernel,
        out_shape=jax.ShapeDtypeStruct((B, N, P), x.dtype),
        grid=(B,),
        in_specs=in_specs,
        out_specs=out_spec,
        compiler_params=pltpu.CompilerParams(
            dimension_semantics=("parallel",),
            vmem_limit_bytes=vmem_limit),
        cost_estimate=cost,
    )(x_c, adj_k, W_cat, bias_eff)

    if P != Fout:
        out = out[..., :Fout]
    return out


def gat_reference(x, adj, W, a1, a2, bias, Wc, bc, alpha):
    """Pure-JAX reference mirroring the PyTorch forward (eval mode)."""
    h = jnp.einsum("bnf,fo->bno", x, W)
    f1 = jnp.einsum("bno,ok->bnk", h, a1)               # (B, N, 1)
    f2 = jnp.einsum("bno,ok->bnk", h, a2)               # (B, N, 1)
    e = f1 + jnp.swapaxes(f2, 1, 2)                     # (B, N, N)
    e = jnp.where(e > 0, e, alpha * e)
    att = adj * e
    att = jax.nn.softmax(att, axis=1)                   # dim=1, as in the PyTorch code
    h_prime = jnp.einsum("bij,bjo->bio", att, h) + bias[None]
    if x.shape[-1] != h_prime.shape[-1]:
        skip = jnp.einsum("bnf,fo->bno", x, Wc) + bc[None]
    else:
        skip = x
    return h_prime + skip


def xavier_uniform(key, shape, gain):
    fan_in, fan_out = shape[0], shape[1]
    bound = gain * math.sqrt(6.0 / (fan_in + fan_out))
    return jax.random.uniform(key, shape, jnp.float32, -bound, bound)


if __name__ == "__main__":
    # Small shapes consistent with the module: B=2 graphs, N=8 nodes,
    # in_features=16, out_features=32 (in != out exercises the Conv1d downsample).
    B, N, Fin, Fout = 2, 8, 16, 32
    alpha = 0.2

    key = jax.random.PRNGKey(0)
    kx, kadj, kw, ka1, ka2, kwc, kbc, kb = jax.random.split(key, 8)

    x = jax.random.normal(kx, (B, N, Fin), jnp.float32)
    adj = (jax.random.uniform(kadj, (B, N, N)) > 0.5).astype(jnp.float32)

    gain = math.sqrt(2.0)
    W = xavier_uniform(kw, (Fin, Fout), gain)
    a1 = xavier_uniform(ka1, (Fout, 1), gain)
    a2 = xavier_uniform(ka2, (Fout, 1), gain)
    bias = 0.1 * jax.random.normal(kb, (N, Fout), jnp.float32)  # zero-init param; nonzero to exercise the path

    # Conv1d(in, out, 1) weight (out, in, 1) -> stored transposed as (in, out).
    cbound = 1.0 / math.sqrt(Fin)
    Wc = jax.random.uniform(kwc, (Fin, Fout), jnp.float32, -cbound, cbound)
    bc = jax.random.uniform(kbc, (1, Fout), jnp.float32, -cbound, cbound)

    # --- Path 1: in != out (Conv1d downsample skip), bf16 MXU operands.
    #     Tolerance accommodates bf16 operands (softmax logit error amplified
    #     through exp) and the approximate EUP reciprocal; structural errors
    #     would be orders of magnitude larger.
    out = jax.block_until_ready(gat_forward(x, adj, W, a1, a2, bias, Wc, bc, alpha))
    ref = gat_reference(x, adj, W, a1, a2, bias, Wc, bc, alpha)
    assert out.shape == (B, N, Fout)
    assert jnp.allclose(out, ref, atol=0.15, rtol=0.1), "mismatch (downsample, bf16)"

    # --- Same path with f32 MXU operands: only the approx softmax reciprocal
    #     differs from the pure-JAX reference, so the tolerance is tight.
    out_f32 = jax.block_until_ready(
        gat_forward(x, adj, W, a1, a2, bias, Wc, bc, alpha,
                    compute_dtype=jnp.float32))
    assert jnp.allclose(out_f32, ref, atol=1e-2, rtol=1e-2), "mismatch (downsample, f32)"

    # --- Path 2: in == out (identity residual folded into the fused projection).
    x_sq = jax.random.normal(kx, (B, N, Fout), jnp.float32)
    W_sq = xavier_uniform(kw, (Fout, Fout), gain)
    out2 = jax.block_until_ready(
        gat_forward(x_sq, adj, W_sq, a1, a2, bias, Wc, bc, alpha))
    ref2 = gat_reference(x_sq, adj, W_sq, a1, a2, bias, Wc, bc, alpha)
    assert out2.shape == (B, N, Fout)
    assert jnp.allclose(out2, ref2, atol=0.15, rtol=0.1), "mismatch (identity, bf16)"

    print("KERNEL_OK")
</pallas_src>

<mosaic_0001>
module attributes {stable_mosaic.version = 11 : i64} {
  func.func @gat_kernel(%arg0: i32, %arg1: memref<1x8x16xbf16, #tpu.memory_space<vmem>>, %arg2: memref<1x8x8xi8, #tpu.memory_space<vmem>>, %arg3: memref<16x384xbf16, #tpu.memory_space<vmem>>, %arg4: memref<8x128xf32, #tpu.memory_space<vmem>>, %arg5: memref<1x8x128xf32, #tpu.memory_space<vmem>>) attributes {dimension_semantics = [#tpu.dimension_semantics<parallel>], iteration_bounds = array<i64: 2>, scalar_prefetch = 0 : i64, scratch_operands = 0 : i64, tpu.core_type = #tpu.core_type<tc>, window_params = [{transform_indices = @transform_0, window_bounds = array<i64: 1, 8, 16>}, {transform_indices = @transform_1, window_bounds = array<i64: 1, 8, 8>}, {pipeline_mode = #tpu.pipeline_mode<synchronous>, transform_indices = @transform_2, window_bounds = array<i64: 16, 384>}, {pipeline_mode = #tpu.pipeline_mode<synchronous>, transform_indices = @transform_3, window_bounds = array<i64: 8, 128>}, {transform_indices = @transform_4, window_bounds = array<i64: 1, 8, 128>}]} {
    %c0 = arith.constant 0 : index
    %c0_0 = arith.constant 0 : index
    %c0_1 = arith.constant 0 : index
    %0 = vector.load %arg1[%c0, %c0_0, %c0_1] : memref<1x8x16xbf16, #tpu.memory_space<vmem>>, vector<1x8x16xbf16>
    %1 = vector.shape_cast %0 : vector<1x8x16xbf16> to vector<8x16xbf16>
    %c0_2 = arith.constant 0 : index
    %c0_3 = arith.constant 0 : index
    %2 = vector.load %arg3[%c0_2, %c0_3] : memref<16x384xbf16, #tpu.memory_space<vmem>>, vector<16x384xbf16>
    %cst = arith.constant dense<0.000000e+00> : vector<8x384xf32>
    %3 = tpu.matmul %1, %2, %cst {dimension_numbers = #tpu.dot_dimension_numbers<[1], [0], [0], [1], [0, 0, 1, 1], [], []>} : vector<8x16xbf16>, vector<16x384xbf16>, vector<8x384xf32> -> vector<8x384xf32>
    %4 = vector.extract_strided_slice %3 {offsets = [0, 0], sizes = [8, 128], strides = [1, 1]} : vector<8x384xf32> to vector<8x128xf32>
    %5 = vector.extract_strided_slice %3 {offsets = [0, 128], sizes = [8, 128], strides = [1, 1]} : vector<8x384xf32> to vector<8x128xf32>
    %6 = vector.extract_strided_slice %3 {offsets = [0, 256], sizes = [8, 1], strides = [1, 1]} : vector<8x384xf32> to vector<8x1xf32>
    %7 = vector.extract_strided_slice %3 {offsets = [0, 257], sizes = [8, 1], strides = [1, 1]} : vector<8x384xf32> to vector<8x1xf32>
    %8 = tpu.transpose %7, [1, 0] : vector<8x1xf32> -> vector<1x8xf32>
    %9 = vector.broadcast %6 : vector<8x1xf32> to vector<8x8xf32>
    %10 = vector.broadcast %8 : vector<1x8xf32> to vector<8x8xf32>
    %11 = arith.addf %9, %10 : vector<8x8xf32>
    %cst_4 = arith.constant 2.000000e-01 : f32
    %12 = vector.broadcast %cst_4 : f32 to vector<8x8xf32>
    %13 = arith.mulf %12, %11 : vector<8x8xf32>
    %14 = arith.maximumf %11, %13 : vector<8x8xf32>
    %c0_5 = arith.constant 0 : index
    %c0_6 = arith.constant 0 : index
    %c0_7 = arith.constant 0 : index
    %15 = vector.load %arg2[%c0_5, %c0_6, %c0_7] : memref<1x8x8xi8, #tpu.memory_space<vmem>>, vector<1x8x8xi8>
    %16 = vector.shape_cast %15 : vector<1x8x8xi8> to vector<8x8xi8>
    %17 = arith.sitofp %16 : vector<8x8xi8> to vector<8x8xf32>
    %cst_8 = arith.constant 0.000000e+00 : f32
    %18 = vector.broadcast %cst_8 : f32 to vector<8x8xf32>
    %19 = arith.cmpf one, %17, %18 : vector<8x8xf32>
    %cst_9 = arith.constant 0.000000e+00 : f32
    %20 = vector.broadcast %cst_9 : f32 to vector<8x8xf32>
    %21 = arith.select %19, %14, %20 : vector<8x8xi1>, vector<8x8xf32>
    %cst_10 = arith.constant dense<0xFF800000> : vector<8xf32>
    %22 = vector.multi_reduction <maximumf>, %21, %cst_10 [0] : vector<8x8xf32> to vector<8xf32>
    %23 = vector.shape_cast %22 : vector<8xf32> to vector<1x8xf32>
    %24 = vector.broadcast %23 : vector<1x8xf32> to vector<8x8xf32>
    %25 = arith.subf %21, %24 : vector<8x8xf32>
    %26 = math.exp %25 : vector<8x8xf32>
    %cst_11 = arith.constant dense<0.000000e+00> : vector<8xf32>
    %27 = vector.multi_reduction <add>, %26, %cst_11 [0] : vector<8x8xf32> to vector<8xf32>
    %28 = vector.shape_cast %27 : vector<8xf32> to vector<1x8xf32>
    %29 = tpu.reciprocal %28 {approx = true} : vector<1x8xf32> -> vector<1x8xf32>
    %30 = vector.broadcast %29 : vector<1x8xf32> to vector<8x8xf32>
    %31 = arith.mulf %26, %30 : vector<8x8xf32>
    %32 = arith.truncf %31 : vector<8x8xf32> to vector<8x8xbf16>
    %33 = arith.truncf %4 : vector<8x128xf32> to vector<8x128xbf16>
    %cst_12 = arith.constant dense<0.000000e+00> : vector<8x128xf32>
    %34 = tpu.matmul %32, %33, %cst_12 {dimension_numbers = #tpu.dot_dimension_numbers<[1], [0], [0], [1], [0, 0, 1, 1], [], []>} : vector<8x8xbf16>, vector<8x128xbf16>, vector<8x128xf32> -> vector<8x128xf32>
    %c0_13 = arith.constant 0 : index
    %c0_14 = arith.constant 0 : index
    %35 = vector.load %arg4[%c0_13, %c0_14] : memref<8x128xf32, #tpu.memory_space<vmem>>, vector<8x128xf32>
    %36 = arith.addf %34, %35 : vector<8x128xf32>
    %37 = arith.addf %36, %5 : vector<8x128xf32>
    %c0_15 = arith.constant 0 : index
    %c0_16 = arith.constant 0 : index
    %c0_17 = arith.constant 0 : index
    %38 = vector.load %arg5[%c0_15, %c0_16, %c0_17] : memref<1x8x128xf32, #tpu.memory_space<vmem>>, vector<1x8x128xf32>
    %39 = vector.shape_cast %38 : vector<1x8x128xf32> to vector<8x128xf32>
    %40 = vector.shape_cast %37 : vector<8x128xf32> to vector<1x8x128xf32>
    tpu.vector_store %arg5[%c0_15, %c0_16, %c0_17], %40 {strides = array<i32>} : memref<1x8x128xf32, #tpu.memory_space<vmem>>, vector<1x8x128xf32>,
    return
  }
  func.func @transform_0(%arg0: i32) -> (i32, i32, i32) {
    %c0_i32 = arith.constant 0 : i32
    %c0_i32_0 = arith.constant 0 : i32
    %c0_i32_1 = arith.constant 0 : i32
    return %arg0, %c0_i32, %c0_i32_0 : i32, i32, i32
  }
  func.func @transform_1(%arg0: i32) -> (i32, i32, i32) {
    %c0_i32 = arith.constant 0 : i32
    %c0_i32_0 = arith.constant 0 : i32
    %c0_i32_1 = arith.constant 0 : i32
    return %arg0, %c0_i32, %c0_i32_0 : i32, i32, i32
  }
  func.func @transform_2(%arg0: i32) -> (i32, i32) {
    %c0_i32 = arith.constant 0 : i32
    %c0_i32_0 = arith.constant 0 : i32
    %c0_i32_1 = arith.constant 0 : i32
    return %c0_i32, %c0_i32_0 : i32, i32
  }
  func.func @transform_3(%arg0: i32) -> (i32, i32) {
    %c0_i32 = arith.constant 0 : i32
    %c0_i32_0 = arith.constant 0 : i32
    %c0_i32_1 = arith.constant 0 : i32
    return %c0_i32, %c0_i32_0 : i32, i32
  }
  func.func @transform_4(%arg0: i32) -> (i32, i32, i32) {
    %c0_i32 = arith.constant 0 : i32
    %c0_i32_0 = arith.constant 0 : i32
    %c0_i32_1 = arith.constant 0 : i32
    return %arg0, %c0_i32, %c0_i32_0 : i32, i32, i32
  }
}

</mosaic_0001>

<bundles_post_ra>
// kernel: tpu_custom_call.1
= control target key start
LH: loop header
LB: loop body
LE: loop exit
PB: predicated region body
PF: predicated region fallthrough
CT: control target
= control target key end

     0   :  { %s1112_s0 = inlined_call_operand.hbm [shape: bf16[2,8,16], index: 0, kind: input, shape index: {}]   ;;  %s1113_s1 = inlined_call_operand.hbm [shape: s8[2,8,8], index: 1, kind: input, shape index: {}]   ;;  %s1114_s2 = inlined_call_operand.hbm [shape: bf16[16,384], index: 2, kind: input, shape index: {}]   ;;  %s1115_s3 = inlined_call_operand.hbm [shape: f32[8,128], index: 3, kind: input, shape index: {}]   ;;  %s1116_s4 = inlined_call_operand.hbm [shape: f32[2,8,128], index: 4, kind: output, shape index: {}]  }
   0x1   :  { %1117 = sst [smem:[#allocation17_spill]] %s1114_s2 }
   0x2   :  { %1118 = sst [smem:[#allocation18_spill]] %s1115_s3 }
   0x3   :  { %9 = vsyncpa [#allocation3], 0 }
   0x4   :  { %11 = vsyncpa [#allocation3 + $0x1], 0 }
   0x5   :  { %12 = vsyncpa [#allocation6], 0 }
   0x6   :  { %14 = vsyncpa [#allocation6 + $0x1], 0 }
   0x7   :  { %15 = vsyncpa [#allocation9], 0 }
   0x8   :  { %16 = vsyncpa [#allocation4], 0 }
   0x9   :  { %18 = vsyncpa [#allocation4 + $0x1], 0  ;;  %s923_s15 = smov 0   ;;  %s925_s16 = smov 0  }
   0xa   :  { %s927_s17 = smov 0   ;;  %s929_s18 = smov 0  }
   0xb LB: > { %s1119_s2 = sld [smem:[#allocation17_spill]]  ;;  %s947_s22 = sadd.s32 4294967295, %s890_s18   ;;  %s890_s18 = sphi %s929_s18, %s1133_s18   ;;  %s886_s17 = sphi %s927_s17, %s1132_s17   ;;  %s882_s16 = sphi %s925_s16, %s1131_s16   ;;  %s878_s15 = sphi %s923_s15, %s1130_s15  }
   0xc   : > { %p573_p0 = scmp.ge.s32.totalorder %s890_s18, 1  ;;  %p45_p1 = scmp.eq.s32.totalorder %s947_s22, 0 }
   0xd   : > { %p149_p2 = scmp.lt.s32.totalorder %s890_s18, 3  ;;  %s892_s24 = smov [#allocation7]  }
   0xe   : > { %s162_s25 = sshll.u32 %s892_s24, 4  ;;  %s1121_s3 = sld [smem:[#allocation18_spill]]  ;;  %s163_s25 = int_to_ptr.vmem [resolvable:$true] %s162_s25 }
   0xf   : > { %p952_p3 = pnand %p573_p0, %p149_p2  ;;  %s893_s29 = smov [#allocation8]  }
  0x10   : > { %s177_s30 = sshll.u32 %s893_s29, 4  ;;  %s894_s5 = smov 192   ;;  %s178_s30 = int_to_ptr.vmem [resolvable:$true] %s177_s30 }
  0x11   : > { %s160_s21 = sshll.u32 %s1119_s2, 4  ;;  %p624_p4 = pneg %p952_p3  ;;  %s161_s21 = int_to_ptr.hbm [resolvable:$true] %s160_s21 }
  0x12   : > { %s895_s6 = smov 12   ;;  %s572_s7 = sadd.s32 4294967294, %s890_s18  }
  0x13   : > { %p625_p6 = pnand %p624_p4, %p45_p1  ;;  %s966_s8 = sadd.s32 1, %s890_s18  }
  0x14   : > { %s175_s28 = sshll.u32 %s1121_s3, 4  ;;  %s28_s9 = ssub.s32 %s890_s18, %s966_s8  ;;  %s176_s28 = int_to_ptr.hbm [resolvable:$true] %s175_s28 }
  0x15   : > { %627 = dma.hbm_to_vmem [thread:$0]  (!%p625_p6), %s161_s21, 384, %s163_s25, [#allocation6], %s894_s5, %s894_s5, %s895_s6  }
  0x16   : > { %630 = dma.hbm_to_vmem [thread:$0]  (!%p625_p6), %s176_s28, 128, %s178_s30, [#allocation9]  }
  0x17   : > { %s31_s10 = sadd.s32 1, %s886_s17  ;;  %p29_p7 = scmp.eq.s32.totalorder %s28_s9, 0 }
  0x18   : > { %p38_p8 = scmp.ne.s32.totalorder %s886_s17, %s882_s16  ;;  %p39_p9 = scmp.eq.s32.totalorder %s890_s18, 0 }
  0x19   : > { %p44_p10 = scmp.ne.s32.totalorder %s882_s16, %s878_s15  ;;  %p136_p13 = scmp.eq.s32.totalorder %s947_s22, 1 }
  0x1a   : > { %s977_s11 = scalar_select %p29_p7, %s886_s17, %s31_s10  }
  0x1b   : > { %p979_p11 = por %p39_p9, %p38_p8  ;;  %p985_p12 = por %p45_p1, %p44_p10 }
  0x1c   : > { %1122 = sst [smem:[#allocation16_spill]] %s977_s11  ;;  %p142_p0 = scmp.eq.s32.totalorder %s572_s7, 1 }
  0x1d   : > { %p644_p2 = scmp.lt.s32.totalorder %s890_s18, 2  ;;  %s992_s14 = sand.u32 1, %s886_s17  }
  0x1e   : > { %p994_p4 = por %p136_p13, %p38_p8  ;;  %p998_p6 = por %p142_p0, %p44_p10 }
  0x1f   : > { %s577_s21 = sshll.u32 %s992_s14, 2  ;;  %s578_s24 = sshll.u32 %s890_s18, 2 }
  0x20   : > { %s196_s27 = scalar_lea.hbm %s1112_s0, %s578_s24  ;;  %s192_s28 = scalar_lea.vmem [#allocation2], %s577_s21 }
  0x21   : > { %s200_s29 = sshll.u32 %s192_s28, 4  ;;  %s198_s30 = sshll.u32 %s196_s27, 4  ;;  %s201_s29 = int_to_ptr.vmem [resolvable:$true] %s200_s29  ;;  %s199_s30 = int_to_ptr.hbm [resolvable:$true] %s198_s30 }
  0x22   : > { %p1009_p7 = pnand %p644_p2, %p979_p11  ;;  %s207_s6 = sand.u32 1, %s890_s18  }
  0x23   : > { %s579_s7 = sshll.u32 %s992_s14, 1  ;;  %s189_s9 = scalar_lea.sflag [#allocation3], %s992_s14 }
  0x24   : > { %s752_s10 = sshra.s32 %s199_s30, 4  ;;  %p756_p9 = pneg %p1009_p7  ;;  %s753_s10 = int_to_ptr.hbm [resolvable:$true] %s752_s10 }
  0x25   : > { %s754_s2 = scalar_lea.hbm %s753_s10, 4  ;;  %s759_s24 = scalar_lea.hbm %s1112_s0, 8 }
  0x26   : > { %p755_p8 = scmp.ne.s32.totalorder %s753_s10, %s754_s2  ;;  %p760_p11 = scmp.lt.s32.totalorder %s753_s10, %s1112_s0 }
  0x27   : > { %p761_p0 = scmp.lt.s32.totalorder %s759_s24, %s754_s2 }
  0x28   : > { %p757_p10 = pnand %p756_p9, %p755_p8 }
  0x29   : > { %p762_p2 = por %p761_p0, %p760_p11 }
  0x2a   : > { %p758_p13 = pneg %p757_p10 }
  0x2c   : > { %p763_p5 = pnand %p762_p2, %p758_p13 }
  0x2e   : > { %766 = shalt.err (!%p763_p5)
}
  0x2f   : > { %634 = dma.hbm_to_vmem [thread:$0]  (!%p1009_p7), %s199_s30, 64, %s201_s29, %s189_s9  }
  0x30   : > { %s580_s14 = sshll.u32 %s890_s18, 1  ;;  %s211_s12 = scalar_lea.vmem [#allocation5], %s579_s7 }
  0x31   : > { %s215_s3 = scalar_lea.hbm %s1113_s1, %s580_s14  ;;  %s219_s21 = sshll.u32 %s211_s12, 4  ;;  %s220_s21 = int_to_ptr.vmem [resolvable:$true] %s219_s21 }
  0x32   : > { %s217_s11 = sshll.u32 %s215_s3, 4  ;;  %s208_s10 = scalar_lea.sflag [#allocation6], %s207_s6  ;;  %s218_s11 = int_to_ptr.hbm [resolvable:$true] %s217_s11 }
  0x33   : > { %s782_s2 = sshra.s32 %s218_s11, 4  ;;  %s789_s9 = scalar_lea.hbm %s1113_s1, 4  ;;  %s783_s2 = int_to_ptr.hbm [resolvable:$true] %s782_s2 }
  0x34   : > { %s784_s24 = scalar_lea.hbm %s783_s2, 2  ;;  %p790_p13 = scmp.lt.s32.totalorder %s783_s2, %s1113_s1 }
  0x35   : > { %p785_p5 = scmp.ne.s32.totalorder %s783_s2, %s784_s24  ;;  %p791_p11 = scmp.lt.s32.totalorder %s789_s9, %s784_s24 }
  0x37   : > { %p787_p8 = pnand %p785_p5, %p756_p9  ;;  %p792_p0 = por %p791_p11, %p790_p13 }
  0x39   : > { %p788_p10 = pneg %p787_p8 }
  0x3b   : > { %p793_p2 = pnand %p792_p0, %p788_p10 }
  0x3d   : > { %796 = shalt.err (!%p793_p2)
}
  0x3e   : > { %637 = dma.hbm_to_vmem [thread:$0]  (!%p1009_p7), %s218_s11, 32, %s220_s21, %s208_s10  }
  0x3f   : > { %228 = sbr.rel (%p952_p3) target bundleno = 691 (0x2b3), region = 36  ;;  %s1047_s3 = sand.u32 (!%p952_p3), 1, %s882_s16  }
  0x40   : > { %s582_s6 = sshll.u32 (!%p952_p3), %s1047_s3, 2  ;;  %s231_s7 = scalar_lea.sflag (!%p952_p3), [#allocation3], %s1047_s3 }
  0x41   : > { %s234_s14 = scalar_lea.vmem (!%p952_p3), [#allocation2], %s582_s6 }
  0x44   : > { %857 = dma.done.wait (%p985_p12), %s231_s7, 64  }
  0x45   : > { %859 = vsyncadd (%p985_p12), %s231_s7, 4294967232  ;;  %s240_s11 = sand.u32 1, %s947_s22   ;;  %s583_s23 = sshll.u32 %s1047_s3, 1 }
  0x46   : > { %s241_s5 = scalar_lea.sflag [#allocation6], %s240_s11  ;;  %s1057_s27 = scalar_lea.vmem [#allocation5], %s583_s23 }
  0x47   : > { %861 = dma.done.wait (%p985_p12), %s241_s5, 32  }
  0x48   : > { %863 = vsyncadd (%p985_p12), %s241_s5, 4294967264 }
  0x49   : > { %865 = dma.done.wait (%p45_p1), [#allocation6], 384  }
  0x4a   : > { %867 = vsyncadd (%p45_p1), [#allocation6], 4294966912 }
  0x4b   : > { %869 = dma.done.wait (%p45_p1), [#allocation9], 128  }
  0x4c   : > { %871 = vsyncadd (%p45_p1), [#allocation9], 4294967168  ;;  %v597_v0 = vld [vmem:[#allocation7 + $0x8] sm:$0xf]  ;;  %v609_v1 = vld [vmem:[#allocation7 + $0x10] sm:$0xf0] }
  0x4d   : > { %v598_v2 = vor.u32 %v609_v1, %v597_v0  ;;  %v286_v3 = vld [vmem:[%s234_s14] sm:$0xf]  ;;  %vm307_vm0 = vcmask 130048   ;;  %v896_v4 = vmov 0   ;;  %s897_s13 = smov 127   ;;  %vm425_vm1 = vcmask 1043456  }
  0x4e   : > { %687 = vset.pattern.permute.xlu0 %v896_v4  ;;  %v589_v7 = vld [vmem:[#allocation7] sm:$0xf]  ;;  %v608_v8 = vld [vmem:[#allocation7 + $0x8] sm:$0xf0]  ;;  %v607_v12 = vld [vmem:[#allocation7 + $0x4] sm:$0xf] }
  0x4f   : > { %344 = vmatpush.bf16.msra.mxu2 %v598_v2  ;;  %v590_v9 = vor.u32 %v608_v8, %v589_v7  ;;  %v591_v13 = vld [vmem:[#allocation7 + $0xc] sm:$0xf0]  ;;  %v394_v18 = vld [vmem:[%s1057_s27] sm:$0x3]  ;;  %vm399_vm3 = vcmask 64512   ;;  %s586_s28 = sshll.u32 %s1047_s3, 3 }
  0x50   : > { %v594_v15 = vor.u32 %v607_v12, %v591_v13  ;;  %v395_v19 = vunpack.c.0.s8 %v394_v18  ;;  %s604_s12 = sshll.u32 %s947_s22, 3  ;;  %v421_v50 = vld [vmem:[#allocation8] sm:$0xff]  ;;  %s284_s24 = scalar_lea.vmem [#allocation10], %s586_s28 }
  0x51   : > { %318 = vmatpush.bf16.msra.mxu0 %v590_v9  ;;  %s455_s2 = scalar_lea.hbm %s1116_s4, %s604_s12  ;;  %s457_s29 = sshll.u32 %s284_s24, 4  ;;  %s458_s29 = int_to_ptr.vmem [resolvable:$true] %s457_s29 }
  0x52   : > { %601 = vmatmul.msk.bf16.vlgmr.msra.gmra.mxu2 %vm307_vm0, %v286_v3  ;;  %331 = vmatpush.bf16.msra.mxu1 %v594_v15  ;;  %v396_v23 = vcvt.s32.f32 %v395_v19  ;;  %s459_s30 = sshll.u32 %s455_s2, 4  ;;  %s445_s9 = scalar_lea.sflag [#allocation4], %s1047_s3  ;;  %s460_s30 = int_to_ptr.hbm [resolvable:$true] %s459_s30 }
  0x53   : > { %s826_s25 = sshra.s32 %s460_s30, 4  ;;  %s832_s7 = scalar_lea.hbm %s1116_s4, 16  ;;  %s827_s25 = int_to_ptr.hbm [resolvable:$true] %s826_s25 }
  0x54   : > { %599 = vmatmul.msk.bf16.vlgmr.msra.gmra.mxu0 %vm307_vm0, %v286_v3  ;;  %vm397_vm2 = vcmp.ne.f32.partialorder %v396_v23, 0.0  ;;  %s828_s26 = scalar_lea.hbm %s827_s25, 8  ;;  %p833_p7 = scmp.lt.s32.totalorder %s827_s25, %s1116_s4 }
  0x55   : > { %600 = vmatmul.msk.bf16.vlgmr.msra.gmra.mxu1 %vm307_vm0, %v286_v3  ;;  %p829_p1 = scmp.ne.s32.totalorder %s827_s25, %s828_s26  ;;  %p834_p9 = scmp.lt.s32.totalorder %s832_s7, %s828_s26 }
  0x57   : > { %p830_p3 = pnand %p829_p1, %p994_p4  ;;  %p835_p5 = por %p834_p9, %p833_p7 }
  0x59   : > { %p831_p12 = pneg %p830_p3 }
  0x5b   : > { %p836_p8 = pnand %p835_p5, %p831_p12 }
  0xd1   : > { %v320_v11 = vpop.f32.mrf.mxu0 }
  0xd2   : > { %v420_v14 = vpack.c.bf16 %v320_v11, %v320_v11  ;;  %v333_v48 = vpop.f32.mrf.mxu1 }
  0xd4   : > { %v427_v16 = vsel %vm425_vm1, %v420_v14, 0 }
  0xd5   : > { %v346_v5 = vpop.f32.mrf.mxu2  ;;  %436 = vmatpush.bf16.msra.mxu3 %v427_v16 }
  0xd6   : > { %351 = vrot.lane.b32.xlu0 %v346_v5, %s897_s13 }
  0xd9   : > { %v322_v17 = vpop.f32.mrf.mxu0 }
  0xda   : > { %v335_v49 = vpop.f32.mrf.mxu1 }
  0xdd   : > { %v348_v6 = vpop.f32.mrf.mxu2 }
  0xde   : > { %387 = vperm.xlu0 %687, %v346_v5  }
 0x148   : > { %v352_v10 = vpop.permute.xlu0 %351 }
 0x149   : > { %354 = vxpose.xlu1.b32.start.end [1/1] (short) (narrow) %v352_v10, 8 }
 0x150   : > { %v388_v22 = vpop.permute.xlu0 %387 }
 0x1ed   : > { %v370_v20 = vpop.trf.xlu1 }
 0x1ee   : > { %v390_v21 = vperm.slane %v370_v20, 0 }
 0x1f0   : > { %v391_v24 = vadd.f32 %v390_v21, %v388_v22 }
 0x1f2   : > { %v392_v25 = vmul.f32 0.2, %v391_v24 }
 0x1f4   : > { %v393_v26 = vmax.f32 %v391_v24, %v392_v25 }
 0x1f6   : > { %v398_v27 = vsel %vm397_vm2, %v393_v26, 0.0 }
 0x1f7   : > { %v400_v28 = vsel %vm399_vm3, %v398_v27, -inf }
 0x1f8   : > { %v401_v29 = vrot.slane %v400_v28, 4 }
 0x1fa   : > { %v402_v30 = vmax.f32 %v400_v28, %v401_v29 }
 0x1fc   : > { %v403_v31 = vrot.slane %v402_v30, 2 }
 0x1fe   : > { %v404_v32 = vmax.f32 %v402_v30, %v403_v31 }
 0x200   : > { %v405_v33 = vrot.slane %v404_v32, 1 }
 0x202   : > { %v406_v34 = vmax.f32 %v404_v32, %v405_v33 }
 0x204   : > { %v407_v35 = vsub.f32 %v398_v27, %v406_v34 }
 0x206   : > { %v408_v36 = vmul.f32 1.442695, %v407_v35 }
 0x208   : > { %688 = vpow2.f32 %v408_v36 }
 0x20e   : > { %v689_v37 = vpop.eup %688 }
 0x20f   : > { %v410_v38 = vsel %vm399_vm3, %v689_v37, 0.0 }
 0x210   : > { %v411_v39 = vrot.slane %v410_v38, 4 }
 0x212   : > { %v412_v40 = vadd.f32 %v411_v39, %v410_v38 }
 0x214   : > { %v413_v41 = vrot.slane %v412_v40, 2 }
 0x216   : > { %v414_v42 = vadd.f32 %v413_v41, %v412_v40 }
 0x218   : > { %v415_v43 = vrot.slane %v414_v42, 1 }
 0x21a   : > { %v416_v44 = vadd.f32 %v415_v43, %v414_v42 }
 0x21c   : > { %690 = vrcp.f32 %v416_v44 }
 0x222   : > { %v691_v45 = vpop.eup %690 }
 0x223   : > { %v418_v46 = vmul.f32 %v691_v45, %v689_v37 }
 0x225   : > { %v419_v47 = vpack.c.bf16 %v418_v46, %v418_v46 }
 0x227   : > { %602 = vmatmul.msk.bf16.vlgmr.msra.gmra.mxu3 %vm399_vm3, %v419_v47 }
 0x2aa   : > { %v438_v51 = vpop.f32.mrf.mxu3 }
 0x2ab   : > { %v439_v52 = vadd.f32 %v438_v51, %v421_v50 }
 0x2ad   : > { %v442_v53 = vadd.f32 %v439_v52, %v333_v48 }
 0x2af   : > { %443 = vst [vmem:[%s284_s24] sm:$0xff] %v442_v53 }
 0x2b0   : > { %839 = shalt.err (!%p836_p8)
}
 0x2b1   : > { %622 = dma.vmem_to_hbm [thread:$0]  (%p994_p4), %s458_s29, 128, %s460_s30, %s445_s9  }
 0x2b2   : > { %v440_v54 = vpop.f32.mrf.mxu3 }
 0x2b3 PF: > { %s471_s3 = sand.u32 1, %s878_s15   ;;  %p1128_p10 = scmp.ge.s32.totalorder %s890_s18, 2 }
 0x2b4   : > { %s472_s23 = scalar_lea.sflag [#allocation4], %s471_s3 }
 0x2b5   : > { %p639_p13 = pnand %p1128_p10, %p998_p6 }
 0x2b7   : > { %p640_p11 = pneg %p639_p13 }
 0x2b9   : > { %873 = dma.done.wait (%p640_p11), %s472_s23, 128  }
 0x2ba   : > { %875 = vsyncadd (%p640_p11), %s472_s23, 4294967168  ;;  %s1129_s5 = sld [smem:[#allocation16_spill]]  ;;  %p21_p0 = scmp.ge.s32.totalorder %s966_s8, 4  }
 0x2bb   : > { %s1130_s15 = smov %s882_s16  ;;  %s1131_s16 = smov %s886_s17 }
 0x2bc   : > { %s1133_s18 = smov %s966_s8  ;;  %23 = sbr.rel (!%p21_p0) target bundleno = 11 (0xb), region = 102 }
 0x2c0   : > { %s1132_s17 = smov %s1129_s5 }
 0x2c1   :  { %478 = vsyncpa [#allocation3], 1 }
 0x2c2   :  { %480 = vsyncpa [#allocation3 + $0x1], 1 }
 0x2c3   :  { %481 = vsyncpa [#allocation6], 1 }
 0x2c4   :  { %483 = vsyncpa [#allocation6 + $0x1], 1 }
 0x2c5   :  { %484 = vsyncpa [#allocation9], 1 }
 0x2c6   :  { %485 = vsyncpa [#allocation4], 1 }
 0x2c7   :  { %487 = vsyncpa [#allocation4 + $0x1], 1 }

</bundles_post_ra>
